<compile_context>
chip_gen: v5e
topology: v5e:2x2
jax: 0.10.0
libtpu: 0.0.40
codegen_flags: <defaults>
</compile_context>

<pallas_src>
import functools

import jax
import jax.numpy as jnp
from jax import lax
from jax.experimental import pallas as pl
from jax.experimental.pallas import tpu as pltpu


# ----------------------------------------------------------------------------
# Kernel: one grid step == one batch element.
# ----------------------------------------------------------------------------
def embeddings_kernel(
    ids_ref,      # SMEM (B, S) int32 token ids (scalar prefetch)
    tok_hbm,      # HBM  (V, H) token embedding table (memory_space=pl.ANY)
    pos_ref,      # VMEM (S, H) first S rows of the position table
    gamma_ref,    # VMEM (1, H) LayerNorm weight
    beta_ref,     # VMEM (1, H) LayerNorm bias
    o_ref,        # VMEM (1, S, H) output block
    gather_buf,   # VMEM (S, H) scratch for gathered token rows
    sem,          # DMA semaphores (S,)
    *,
    seq_len: int,
    hidden: int,
):
    eps = 1e-12
    b = pl.program_id(0)

    # --- True row gather: DMA exactly the S needed table rows HBM -> VMEM. ---
    copies = []
    for s in range(seq_len):                      # static, tiny trip count
        row = ids_ref[b, s]                       # scalar read from SMEM
        cp = pltpu.make_async_copy(
            tok_hbm.at[pl.ds(row, 1), :],         # (1, H) row of the table
            gather_buf.at[pl.ds(s, 1), :],        # (1, H) slot in scratch
            sem.at[s],
        )
        cp.start()
        copies.append(cp)
    for cp in copies:
        cp.wait()

    # --- token + position embeddings (f32 on the VPU). ---
    emb = gather_buf[...] + pos_ref[...]          # (S, H)

    # --- LayerNorm over hidden dim: sums * (1/H), rsqrt on the EUP. ---
    inv_h = jnp.float32(1.0 / hidden)
    mu = jnp.sum(emb, axis=-1, keepdims=True) * inv_h
    diff = emb - mu
    var = jnp.sum(diff * diff, axis=-1, keepdims=True) * inv_h
    y = diff * lax.rsqrt(var + eps)
    y = y * gamma_ref[...] + beta_ref[...]

    # TODO(synk): nn.Dropout() is identity in eval mode; training-mode PRNG mask omitted.
    o_ref[0] = y.astype(o_ref.dtype)


# ----------------------------------------------------------------------------
# Wrapper
# ----------------------------------------------------------------------------
def embeddings_forward(ids, tok_table, pos_table, gamma, beta):
    B, S = ids.shape
    V, H = tok_table.shape
    assert S <= pos_table.shape[0]

    ids = ids.astype(jnp.int32)
    pos_used = pos_table[:S]                      # static slice (S, H)
    gamma2 = gamma.reshape(1, H)
    beta2 = beta.reshape(1, H)

    kernel = functools.partial(embeddings_kernel, seq_len=S, hidden=H)

    itemsize = jnp.dtype(tok_table.dtype).itemsize
    bytes_accessed = (
        B * S * H * itemsize       # gathered token rows (HBM reads)
        + B * S * H * itemsize     # output writes
        + S * H * itemsize         # position rows
        + 2 * H * itemsize         # gamma, beta
        + B * S * 4                # ids
    )
    cost = pl.CostEstimate(
        flops=10 * B * S * H,      # LayerNorm + add, rough
        transcendentals=B * S,     # one rsqrt per row
        bytes_accessed=bytes_accessed,
    )

    return pl.pallas_call(
        kernel,
        out_shape=jax.ShapeDtypeStruct((B, S, H), tok_table.dtype),
        grid_spec=pltpu.PrefetchScalarGridSpec(
            num_scalar_prefetch=1,                              # ids -> SMEM
            grid=(B,),
            in_specs=[
                pl.BlockSpec(memory_space=pl.ANY),              # token table stays in HBM
                pl.BlockSpec((S, H), lambda b, ids: (0, 0)),    # positions
                pl.BlockSpec((1, H), lambda b, ids: (0, 0)),    # gamma
                pl.BlockSpec((1, H), lambda b, ids: (0, 0)),    # beta
            ],
            out_specs=pl.BlockSpec((1, S, H), lambda b, ids: (b, 0, 0)),
            scratch_shapes=[
                pltpu.VMEM((S, H), tok_table.dtype),            # gathered rows
                pltpu.SemaphoreType.DMA((S,)),                  # one sem per row DMA
            ],
        ),
        compiler_params=pltpu.CompilerParams(
            dimension_semantics=("parallel",)),                 # 2-way across v7x TCs
        cost_estimate=cost,
    )(ids, tok_table, pos_used, gamma2, beta2)


# ----------------------------------------------------------------------------
# Pure-JAX reference (mirrors the PyTorch forward).
# ----------------------------------------------------------------------------
def reference(ids, tok_table, pos_table, gamma, beta):
    eps = 1e-12
    S = ids.shape[1]
    tok = tok_table[ids]                          # (B, S, H)
    pos = pos_table[:S][None]                     # (1, S, H)
    emb = tok + pos
    mu = emb.mean(-1, keepdims=True)
    var = ((emb - mu) ** 2).mean(-1, keepdims=True)
    return (emb - mu) / jnp.sqrt(var + eps) * gamma + beta


# ----------------------------------------------------------------------------
if __name__ == "__main__":
    # Small config: vocab=128, max_positions=64, hidden=32, batch=2, seq=8.
    B, S, V, P, H = 2, 8, 128, 64, 32

    key = jax.random.PRNGKey(0)
    k_ids, k_tok, k_pos, k_g, k_b = jax.random.split(key, 5)

    ids = jax.random.randint(k_ids, (B, S), 0, V, dtype=jnp.int32)
    tok_table = 0.05 * jax.random.normal(k_tok, (V, H), jnp.float32)
    pos_table = 0.05 * jax.random.normal(k_pos, (P, H), jnp.float32)
    gamma = 1.0 + 0.05 * jax.random.normal(k_g, (H,), jnp.float32)
    beta = 0.05 * jax.random.normal(k_b, (H,), jnp.float32)

    out = embeddings_forward(ids, tok_table, pos_table, gamma, beta)
    out = jax.block_until_ready(out)

    ref = reference(ids, tok_table, pos_table, gamma, beta)
    assert out.shape == (B, S, H)
    assert jnp.allclose(out, ref, atol=1e-5, rtol=1e-5), "mismatch vs reference"

    print("KERNEL_OK")
</pallas_src>

<mosaic_0001>
module attributes {stable_mosaic.version = 11 : i64} {
  func.func @embeddings_kernel(%arg0: i32, %arg1: memref<2x8xi32, #tpu.memory_space<smem>>, %arg2: memref<128x32xf32, #tpu.memory_space<any>>, %arg3: memref<8x32xf32, #tpu.memory_space<vmem>>, %arg4: memref<1x32xf32, #tpu.memory_space<vmem>>, %arg5: memref<1x32xf32, #tpu.memory_space<vmem>>, %arg6: memref<1x8x32xf32, #tpu.memory_space<vmem>>, %arg7: memref<8x32xf32, #tpu.memory_space<vmem>>, %arg8: memref<8x!tpu.dma_semaphore, #tpu.memory_space<semaphore_mem>>) attributes {dimension_semantics = [#tpu.dimension_semantics<parallel>], iteration_bounds = array<i64: 2>, scalar_prefetch = 1 : i64, scratch_operands = 2 : i64, tpu.core_type = #tpu.core_type<tc>, window_params = [{}, {pipeline_mode = #tpu.pipeline_mode<synchronous>, transform_indices = @transform_1, window_bounds = array<i64: 8, 32>}, {pipeline_mode = #tpu.pipeline_mode<synchronous>, transform_indices = @transform_2, window_bounds = array<i64: 1, 32>}, {pipeline_mode = #tpu.pipeline_mode<synchronous>, transform_indices = @transform_3, window_bounds = array<i64: 1, 32>}, {transform_indices = @transform_4, window_bounds = array<i64: 1, 8, 32>}]} {
    %0 = arith.index_cast %arg0 : i32 to index
    %c0 = arith.constant 0 : index
    %1 = memref.load %arg1[%0, %c0] : memref<2x8xi32, #tpu.memory_space<smem>>
    %c0_i32 = arith.constant 0 : i32
    %c0_i32_0 = arith.constant 0 : i32
    %2 = tpu.memref_slice %arg2[%1, %c0_i32_0] : memref<128x32xf32, #tpu.memory_space<any>> -> memref<1x32xf32, #tpu.memory_space<any>>
    %c0_i32_1 = arith.constant 0 : i32
    %c0_i32_2 = arith.constant 0 : i32
    %3 = tpu.memref_slice %arg7[%c0_i32_1, %c0_i32_2] : memref<8x32xf32, #tpu.memory_space<vmem>> -> memref<1x32xf32, #tpu.memory_space<vmem>>
    %4 = tpu.memref_slice %arg8[%c0_i32] : memref<8x!tpu.dma_semaphore, #tpu.memory_space<semaphore_mem>> -> memref<1x!tpu.dma_semaphore, #tpu.memory_space<semaphore_mem>>
    %5 = tpu.memref_squeeze %4 : memref<1x!tpu.dma_semaphore, #tpu.memory_space<semaphore_mem>> -> memref<!tpu.dma_semaphore, #tpu.memory_space<semaphore_mem>>
    tpu.enqueue_dma source(%2 : memref<1x32xf32, #tpu.memory_space<any>>) target(%3 : memref<1x32xf32, #tpu.memory_space<vmem>>) target_semaphore(%5 : memref<!tpu.dma_semaphore, #tpu.memory_space<semaphore_mem>>)
    %6 = arith.index_cast %arg0 : i32 to index
    %c1 = arith.constant 1 : index
    %7 = memref.load %arg1[%6, %c1] : memref<2x8xi32, #tpu.memory_space<smem>>
    %c1_i32 = arith.constant 1 : i32
    %c0_i32_3 = arith.constant 0 : i32
    %8 = tpu.memref_slice %arg2[%7, %c0_i32_3] : memref<128x32xf32, #tpu.memory_space<any>> -> memref<1x32xf32, #tpu.memory_space<any>>
    %c1_i32_4 = arith.constant 1 : i32
    %c0_i32_5 = arith.constant 0 : i32
    %9 = tpu.memref_slice %arg7[%c1_i32_4, %c0_i32_5] : memref<8x32xf32, #tpu.memory_space<vmem>> -> memref<1x32xf32, #tpu.memory_space<vmem>>
    %10 = tpu.memref_slice %arg8[%c1_i32] : memref<8x!tpu.dma_semaphore, #tpu.memory_space<semaphore_mem>> -> memref<1x!tpu.dma_semaphore, #tpu.memory_space<semaphore_mem>>
    %11 = tpu.memref_squeeze %10 : memref<1x!tpu.dma_semaphore, #tpu.memory_space<semaphore_mem>> -> memref<!tpu.dma_semaphore, #tpu.memory_space<semaphore_mem>>
    tpu.enqueue_dma source(%8 : memref<1x32xf32, #tpu.memory_space<any>>) target(%9 : memref<1x32xf32, #tpu.memory_space<vmem>>) target_semaphore(%11 : memref<!tpu.dma_semaphore, #tpu.memory_space<semaphore_mem>>)
    %12 = arith.index_cast %arg0 : i32 to index
    %c2 = arith.constant 2 : index
    %13 = memref.load %arg1[%12, %c2] : memref<2x8xi32, #tpu.memory_space<smem>>
    %c2_i32 = arith.constant 2 : i32
    %c0_i32_6 = arith.constant 0 : i32
    %14 = tpu.memref_slice %arg2[%13, %c0_i32_6] : memref<128x32xf32, #tpu.memory_space<any>> -> memref<1x32xf32, #tpu.memory_space<any>>
    %c2_i32_7 = arith.constant 2 : i32
    %c0_i32_8 = arith.constant 0 : i32
    %15 = tpu.memref_slice %arg7[%c2_i32_7, %c0_i32_8] : memref<8x32xf32, #tpu.memory_space<vmem>> -> memref<1x32xf32, #tpu.memory_space<vmem>>
    %16 = tpu.memref_slice %arg8[%c2_i32] : memref<8x!tpu.dma_semaphore, #tpu.memory_space<semaphore_mem>> -> memref<1x!tpu.dma_semaphore, #tpu.memory_space<semaphore_mem>>
    %17 = tpu.memref_squeeze %16 : memref<1x!tpu.dma_semaphore, #tpu.memory_space<semaphore_mem>> -> memref<!tpu.dma_semaphore, #tpu.memory_space<semaphore_mem>>
    tpu.enqueue_dma source(%14 : memref<1x32xf32, #tpu.memory_space<any>>) target(%15 : memref<1x32xf32, #tpu.memory_space<vmem>>) target_semaphore(%17 : memref<!tpu.dma_semaphore, #tpu.memory_space<semaphore_mem>>)
    %18 = arith.index_cast %arg0 : i32 to index
    %c3 = arith.constant 3 : index
    %19 = memref.load %arg1[%18, %c3] : memref<2x8xi32, #tpu.memory_space<smem>>
    %c3_i32 = arith.constant 3 : i32
    %c0_i32_9 = arith.constant 0 : i32
    %20 = tpu.memref_slice %arg2[%19, %c0_i32_9] : memref<128x32xf32, #tpu.memory_space<any>> -> memref<1x32xf32, #tpu.memory_space<any>>
    %c3_i32_10 = arith.constant 3 : i32
    %c0_i32_11 = arith.constant 0 : i32
    %21 = tpu.memref_slice %arg7[%c3_i32_10, %c0_i32_11] : memref<8x32xf32, #tpu.memory_space<vmem>> -> memref<1x32xf32, #tpu.memory_space<vmem>>
    %22 = tpu.memref_slice %arg8[%c3_i32] : memref<8x!tpu.dma_semaphore, #tpu.memory_space<semaphore_mem>> -> memref<1x!tpu.dma_semaphore, #tpu.memory_space<semaphore_mem>>
    %23 = tpu.memref_squeeze %22 : memref<1x!tpu.dma_semaphore, #tpu.memory_space<semaphore_mem>> -> memref<!tpu.dma_semaphore, #tpu.memory_space<semaphore_mem>>
    tpu.enqueue_dma source(%20 : memref<1x32xf32, #tpu.memory_space<any>>) target(%21 : memref<1x32xf32, #tpu.memory_space<vmem>>) target_semaphore(%23 : memref<!tpu.dma_semaphore, #tpu.memory_space<semaphore_mem>>)
    %24 = arith.index_cast %arg0 : i32 to index
    %c4 = arith.constant 4 : index
    %25 = memref.load %arg1[%24, %c4] : memref<2x8xi32, #tpu.memory_space<smem>>
    %c4_i32 = arith.constant 4 : i32
    %c0_i32_12 = arith.constant 0 : i32
    %26 = tpu.memref_slice %arg2[%25, %c0_i32_12] : memref<128x32xf32, #tpu.memory_space<any>> -> memref<1x32xf32, #tpu.memory_space<any>>
    %c4_i32_13 = arith.constant 4 : i32
    %c0_i32_14 = arith.constant 0 : i32
    %27 = tpu.memref_slice %arg7[%c4_i32_13, %c0_i32_14] : memref<8x32xf32, #tpu.memory_space<vmem>> -> memref<1x32xf32, #tpu.memory_space<vmem>>
    %28 = tpu.memref_slice %arg8[%c4_i32] : memref<8x!tpu.dma_semaphore, #tpu.memory_space<semaphore_mem>> -> memref<1x!tpu.dma_semaphore, #tpu.memory_space<semaphore_mem>>
    %29 = tpu.memref_squeeze %28 : memref<1x!tpu.dma_semaphore, #tpu.memory_space<semaphore_mem>> -> memref<!tpu.dma_semaphore, #tpu.memory_space<semaphore_mem>>
    tpu.enqueue_dma source(%26 : memref<1x32xf32, #tpu.memory_space<any>>) target(%27 : memref<1x32xf32, #tpu.memory_space<vmem>>) target_semaphore(%29 : memref<!tpu.dma_semaphore, #tpu.memory_space<semaphore_mem>>)
    %30 = arith.index_cast %arg0 : i32 to index
    %c5 = arith.constant 5 : index
    %31 = memref.load %arg1[%30, %c5] : memref<2x8xi32, #tpu.memory_space<smem>>
    %c5_i32 = arith.constant 5 : i32
    %c0_i32_15 = arith.constant 0 : i32
    %32 = tpu.memref_slice %arg2[%31, %c0_i32_15] : memref<128x32xf32, #tpu.memory_space<any>> -> memref<1x32xf32, #tpu.memory_space<any>>
    %c5_i32_16 = arith.constant 5 : i32
    %c0_i32_17 = arith.constant 0 : i32
    %33 = tpu.memref_slice %arg7[%c5_i32_16, %c0_i32_17] : memref<8x32xf32, #tpu.memory_space<vmem>> -> memref<1x32xf32, #tpu.memory_space<vmem>>
    %34 = tpu.memref_slice %arg8[%c5_i32] : memref<8x!tpu.dma_semaphore, #tpu.memory_space<semaphore_mem>> -> memref<1x!tpu.dma_semaphore, #tpu.memory_space<semaphore_mem>>
    %35 = tpu.memref_squeeze %34 : memref<1x!tpu.dma_semaphore, #tpu.memory_space<semaphore_mem>> -> memref<!tpu.dma_semaphore, #tpu.memory_space<semaphore_mem>>
    tpu.enqueue_dma source(%32 : memref<1x32xf32, #tpu.memory_space<any>>) target(%33 : memref<1x32xf32, #tpu.memory_space<vmem>>) target_semaphore(%35 : memref<!tpu.dma_semaphore, #tpu.memory_space<semaphore_mem>>)
    %36 = arith.index_cast %arg0 : i32 to index
    %c6 = arith.constant 6 : index
    %37 = memref.load %arg1[%36, %c6] : memref<2x8xi32, #tpu.memory_space<smem>>
    %c6_i32 = arith.constant 6 : i32
    %c0_i32_18 = arith.constant 0 : i32
    %38 = tpu.memref_slice %arg2[%37, %c0_i32_18] : memref<128x32xf32, #tpu.memory_space<any>> -> memref<1x32xf32, #tpu.memory_space<any>>
    %c6_i32_19 = arith.constant 6 : i32
    %c0_i32_20 = arith.constant 0 : i32
    %39 = tpu.memref_slice %arg7[%c6_i32_19, %c0_i32_20] : memref<8x32xf32, #tpu.memory_space<vmem>> -> memref<1x32xf32, #tpu.memory_space<vmem>>
    %40 = tpu.memref_slice %arg8[%c6_i32] : memref<8x!tpu.dma_semaphore, #tpu.memory_space<semaphore_mem>> -> memref<1x!tpu.dma_semaphore, #tpu.memory_space<semaphore_mem>>
    %41 = tpu.memref_squeeze %40 : memref<1x!tpu.dma_semaphore, #tpu.memory_space<semaphore_mem>> -> memref<!tpu.dma_semaphore, #tpu.memory_space<semaphore_mem>>
    tpu.enqueue_dma source(%38 : memref<1x32xf32, #tpu.memory_space<any>>) target(%39 : memref<1x32xf32, #tpu.memory_space<vmem>>) target_semaphore(%41 : memref<!tpu.dma_semaphore, #tpu.memory_space<semaphore_mem>>)
    %42 = arith.index_cast %arg0 : i32 to index
    %c7 = arith.constant 7 : index
    %43 = memref.load %arg1[%42, %c7] : memref<2x8xi32, #tpu.memory_space<smem>>
    %c7_i32 = arith.constant 7 : i32
    %c0_i32_21 = arith.constant 0 : i32
    %44 = tpu.memref_slice %arg2[%43, %c0_i32_21] : memref<128x32xf32, #tpu.memory_space<any>> -> memref<1x32xf32, #tpu.memory_space<any>>
    %c7_i32_22 = arith.constant 7 : i32
    %c0_i32_23 = arith.constant 0 : i32
    %45 = tpu.memref_slice %arg7[%c7_i32_22, %c0_i32_23] : memref<8x32xf32, #tpu.memory_space<vmem>> -> memref<1x32xf32, #tpu.memory_space<vmem>>
    %46 = tpu.memref_slice %arg8[%c7_i32] : memref<8x!tpu.dma_semaphore, #tpu.memory_space<semaphore_mem>> -> memref<1x!tpu.dma_semaphore, #tpu.memory_space<semaphore_mem>>
    %47 = tpu.memref_squeeze %46 : memref<1x!tpu.dma_semaphore, #tpu.memory_space<semaphore_mem>> -> memref<!tpu.dma_semaphore, #tpu.memory_space<semaphore_mem>>
    tpu.enqueue_dma source(%44 : memref<1x32xf32, #tpu.memory_space<any>>) target(%45 : memref<1x32xf32, #tpu.memory_space<vmem>>) target_semaphore(%47 : memref<!tpu.dma_semaphore, #tpu.memory_space<semaphore_mem>>)
    %c0_i32_24 = arith.constant 0 : i32
    %c0_i32_25 = arith.constant 0 : i32
    %48 = tpu.memref_slice %arg2[%1, %c0_i32_25] : memref<128x32xf32, #tpu.memory_space<any>> -> memref<1x32xf32, #tpu.memory_space<any>>
    %c0_i32_26 = arith.constant 0 : i32
    %c0_i32_27 = arith.constant 0 : i32
    %49 = tpu.memref_slice %arg7[%c0_i32_26, %c0_i32_27] : memref<8x32xf32, #tpu.memory_space<vmem>> -> memref<1x32xf32, #tpu.memory_space<vmem>>
    %50 = tpu.memref_slice %arg8[%c0_i32_24] : memref<8x!tpu.dma_semaphore, #tpu.memory_space<semaphore_mem>> -> memref<1x!tpu.dma_semaphore, #tpu.memory_space<semaphore_mem>>
    %51 = tpu.memref_squeeze %50 : memref<1x!tpu.dma_semaphore, #tpu.memory_space<semaphore_mem>> -> memref<!tpu.dma_semaphore, #tpu.memory_space<semaphore_mem>>
    tpu.wait_dma2 semaphore(%51 : memref<!tpu.dma_semaphore, #tpu.memory_space<semaphore_mem>>) src(%48 : memref<1x32xf32, #tpu.memory_space<any>>) dst(%49 : memref<1x32xf32, #tpu.memory_space<vmem>>)
    %c1_i32_28 = arith.constant 1 : i32
    %c0_i32_29 = arith.constant 0 : i32
    %52 = tpu.memref_slice %arg2[%7, %c0_i32_29] : memref<128x32xf32, #tpu.memory_space<any>> -> memref<1x32xf32, #tpu.memory_space<any>>
    %c1_i32_30 = arith.constant 1 : i32
    %c0_i32_31 = arith.constant 0 : i32
    %53 = tpu.memref_slice %arg7[%c1_i32_30, %c0_i32_31] : memref<8x32xf32, #tpu.memory_space<vmem>> -> memref<1x32xf32, #tpu.memory_space<vmem>>
    %54 = tpu.memref_slice %arg8[%c1_i32_28] : memref<8x!tpu.dma_semaphore, #tpu.memory_space<semaphore_mem>> -> memref<1x!tpu.dma_semaphore, #tpu.memory_space<semaphore_mem>>
    %55 = tpu.memref_squeeze %54 : memref<1x!tpu.dma_semaphore, #tpu.memory_space<semaphore_mem>> -> memref<!tpu.dma_semaphore, #tpu.memory_space<semaphore_mem>>
    tpu.wait_dma2 semaphore(%55 : memref<!tpu.dma_semaphore, #tpu.memory_space<semaphore_mem>>) src(%52 : memref<1x32xf32, #tpu.memory_space<any>>) dst(%53 : memref<1x32xf32, #tpu.memory_space<vmem>>)
    %c2_i32_32 = arith.constant 2 : i32
    %c0_i32_33 = arith.constant 0 : i32
    %56 = tpu.memref_slice %arg2[%13, %c0_i32_33] : memref<128x32xf32, #tpu.memory_space<any>> -> memref<1x32xf32, #tpu.memory_space<any>>
    %c2_i32_34 = arith.constant 2 : i32
    %c0_i32_35 = arith.constant 0 : i32
    %57 = tpu.memref_slice %arg7[%c2_i32_34, %c0_i32_35] : memref<8x32xf32, #tpu.memory_space<vmem>> -> memref<1x32xf32, #tpu.memory_space<vmem>>
    %58 = tpu.memref_slice %arg8[%c2_i32_32] : memref<8x!tpu.dma_semaphore, #tpu.memory_space<semaphore_mem>> -> memref<1x!tpu.dma_semaphore, #tpu.memory_space<semaphore_mem>>
    %59 = tpu.memref_squeeze %58 : memref<1x!tpu.dma_semaphore, #tpu.memory_space<semaphore_mem>> -> memref<!tpu.dma_semaphore, #tpu.memory_space<semaphore_mem>>
    tpu.wait_dma2 semaphore(%59 : memref<!tpu.dma_semaphore, #tpu.memory_space<semaphore_mem>>) src(%56 : memref<1x32xf32, #tpu.memory_space<any>>) dst(%57 : memref<1x32xf32, #tpu.memory_space<vmem>>)
    %c3_i32_36 = arith.constant 3 : i32
    %c0_i32_37 = arith.constant 0 : i32
    %60 = tpu.memref_slice %arg2[%19, %c0_i32_37] : memref<128x32xf32, #tpu.memory_space<any>> -> memref<1x32xf32, #tpu.memory_space<any>>
    %c3_i32_38 = arith.constant 3 : i32
    %c0_i32_39 = arith.constant 0 : i32
    %61 = tpu.memref_slice %arg7[%c3_i32_38, %c0_i32_39] : memref<8x32xf32, #tpu.memory_space<vmem>> -> memref<1x32xf32, #tpu.memory_space<vmem>>
    %62 = tpu.memref_slice %arg8[%c3_i32_36] : memref<8x!tpu.dma_semaphore, #tpu.memory_space<semaphore_mem>> -> memref<1x!tpu.dma_semaphore, #tpu.memory_space<semaphore_mem>>
    %63 = tpu.memref_squeeze %62 : memref<1x!tpu.dma_semaphore, #tpu.memory_space<semaphore_mem>> -> memref<!tpu.dma_semaphore, #tpu.memory_space<semaphore_mem>>
    tpu.wait_dma2 semaphore(%63 : memref<!tpu.dma_semaphore, #tpu.memory_space<semaphore_mem>>) src(%60 : memref<1x32xf32, #tpu.memory_space<any>>) dst(%61 : memref<1x32xf32, #tpu.memory_space<vmem>>)
    %c4_i32_40 = arith.constant 4 : i32
    %c0_i32_41 = arith.constant 0 : i32
    %64 = tpu.memref_slice %arg2[%25, %c0_i32_41] : memref<128x32xf32, #tpu.memory_space<any>> -> memref<1x32xf32, #tpu.memory_space<any>>
    %c4_i32_42 = arith.constant 4 : i32
    %c0_i32_43 = arith.constant 0 : i32
    %65 = tpu.memref_slice %arg7[%c4_i32_42, %c0_i32_43] : memref<8x32xf32, #tpu.memory_space<vmem>> -> memref<1x32xf32, #tpu.memory_space<vmem>>
    %66 = tpu.memref_slice %arg8[%c4_i32_40] : memref<8x!tpu.dma_semaphore, #tpu.memory_space<semaphore_mem>> -> memref<1x!tpu.dma_semaphore, #tpu.memory_space<semaphore_mem>>
    %67 = tpu.memref_squeeze %66 : memref<1x!tpu.dma_semaphore, #tpu.memory_space<semaphore_mem>> -> memref<!tpu.dma_semaphore, #tpu.memory_space<semaphore_mem>>
    tpu.wait_dma2 semaphore(%67 : memref<!tpu.dma_semaphore, #tpu.memory_space<semaphore_mem>>) src(%64 : memref<1x32xf32, #tpu.memory_space<any>>) dst(%65 : memref<1x32xf32, #tpu.memory_space<vmem>>)
    %c5_i32_44 = arith.constant 5 : i32
    %c0_i32_45 = arith.constant 0 : i32
    %68 = tpu.memref_slice %arg2[%31, %c0_i32_45] : memref<128x32xf32, #tpu.memory_space<any>> -> memref<1x32xf32, #tpu.memory_space<any>>
    %c5_i32_46 = arith.constant 5 : i32
    %c0_i32_47 = arith.constant 0 : i32
    %69 = tpu.memref_slice %arg7[%c5_i32_46, %c0_i32_47] : memref<8x32xf32, #tpu.memory_space<vmem>> -> memref<1x32xf32, #tpu.memory_space<vmem>>
    %70 = tpu.memref_slice %arg8[%c5_i32_44] : memref<8x!tpu.dma_semaphore, #tpu.memory_space<semaphore_mem>> -> memref<1x!tpu.dma_semaphore, #tpu.memory_space<semaphore_mem>>
    %71 = tpu.memref_squeeze %70 : memref<1x!tpu.dma_semaphore, #tpu.memory_space<semaphore_mem>> -> memref<!tpu.dma_semaphore, #tpu.memory_space<semaphore_mem>>
    tpu.wait_dma2 semaphore(%71 : memref<!tpu.dma_semaphore, #tpu.memory_space<semaphore_mem>>) src(%68 : memref<1x32xf32, #tpu.memory_space<any>>) dst(%69 : memref<1x32xf32, #tpu.memory_space<vmem>>)
    %c6_i32_48 = arith.constant 6 : i32
    %c0_i32_49 = arith.constant 0 : i32
    %72 = tpu.memref_slice %arg2[%37, %c0_i32_49] : memref<128x32xf32, #tpu.memory_space<any>> -> memref<1x32xf32, #tpu.memory_space<any>>
    %c6_i32_50 = arith.constant 6 : i32
    %c0_i32_51 = arith.constant 0 : i32
    %73 = tpu.memref_slice %arg7[%c6_i32_50, %c0_i32_51] : memref<8x32xf32, #tpu.memory_space<vmem>> -> memref<1x32xf32, #tpu.memory_space<vmem>>
    %74 = tpu.memref_slice %arg8[%c6_i32_48] : memref<8x!tpu.dma_semaphore, #tpu.memory_space<semaphore_mem>> -> memref<1x!tpu.dma_semaphore, #tpu.memory_space<semaphore_mem>>
    %75 = tpu.memref_squeeze %74 : memref<1x!tpu.dma_semaphore, #tpu.memory_space<semaphore_mem>> -> memref<!tpu.dma_semaphore, #tpu.memory_space<semaphore_mem>>
    tpu.wait_dma2 semaphore(%75 : memref<!tpu.dma_semaphore, #tpu.memory_space<semaphore_mem>>) src(%72 : memref<1x32xf32, #tpu.memory_space<any>>) dst(%73 : memref<1x32xf32, #tpu.memory_space<vmem>>)
    %c7_i32_52 = arith.constant 7 : i32
    %c0_i32_53 = arith.constant 0 : i32
    %76 = tpu.memref_slice %arg2[%43, %c0_i32_53] : memref<128x32xf32, #tpu.memory_space<any>> -> memref<1x32xf32, #tpu.memory_space<any>>
    %c7_i32_54 = arith.constant 7 : i32
    %c0_i32_55 = arith.constant 0 : i32
    %77 = tpu.memref_slice %arg7[%c7_i32_54, %c0_i32_55] : memref<8x32xf32, #tpu.memory_space<vmem>> -> memref<1x32xf32, #tpu.memory_space<vmem>>
    %78 = tpu.memref_slice %arg8[%c7_i32_52] : memref<8x!tpu.dma_semaphore, #tpu.memory_space<semaphore_mem>> -> memref<1x!tpu.dma_semaphore, #tpu.memory_space<semaphore_mem>>
    %79 = tpu.memref_squeeze %78 : memref<1x!tpu.dma_semaphore, #tpu.memory_space<semaphore_mem>> -> memref<!tpu.dma_semaphore, #tpu.memory_space<semaphore_mem>>
    tpu.wait_dma2 semaphore(%79 : memref<!tpu.dma_semaphore, #tpu.memory_space<semaphore_mem>>) src(%76 : memref<1x32xf32, #tpu.memory_space<any>>) dst(%77 : memref<1x32xf32, #tpu.memory_space<vmem>>)
    %c0_56 = arith.constant 0 : index
    %c0_57 = arith.constant 0 : index
    %80 = vector.load %arg7[%c0_56, %c0_57] : memref<8x32xf32, #tpu.memory_space<vmem>>, vector<8x32xf32>
    %c0_58 = arith.constant 0 : index
    %c0_59 = arith.constant 0 : index
    %81 = vector.load %arg3[%c0_58, %c0_59] : memref<8x32xf32, #tpu.memory_space<vmem>>, vector<8x32xf32>
    %82 = arith.addf %80, %81 : vector<8x32xf32>
    %cst = arith.constant dense<0.000000e+00> : vector<8xf32>
    %83 = vector.multi_reduction <add>, %82, %cst [1] : vector<8x32xf32> to vector<8xf32>
    %84 = vector.shape_cast %83 : vector<8xf32> to vector<8x1xf32>
    %cst_60 = arith.constant 3.125000e-02 : f32
    %85 = vector.broadcast %cst_60 : f32 to vector<8x1xf32>
    %86 = arith.mulf %84, %85 : vector<8x1xf32>
    %87 = vector.broadcast %86 : vector<8x1xf32> to vector<8x32xf32>
    %88 = arith.subf %82, %87 : vector<8x32xf32>
    %89 = arith.mulf %88, %88 : vector<8x32xf32>
    %cst_61 = arith.constant dense<0.000000e+00> : vector<8xf32>
    %90 = vector.multi_reduction <add>, %89, %cst_61 [1] : vector<8x32xf32> to vector<8xf32>
    %91 = vector.shape_cast %90 : vector<8xf32> to vector<8x1xf32>
    %cst_62 = arith.constant 3.125000e-02 : f32
    %92 = vector.broadcast %cst_62 : f32 to vector<8x1xf32>
    %93 = arith.mulf %91, %92 : vector<8x1xf32>
    %cst_63 = arith.constant 9.99999996E-13 : f32
    %94 = vector.broadcast %cst_63 : f32 to vector<8x1xf32>
    %95 = arith.addf %93, %94 : vector<8x1xf32>
    %96 = math.rsqrt %95 : vector<8x1xf32>
    %97 = vector.broadcast %96 : vector<8x1xf32> to vector<8x32xf32>
    %98 = arith.mulf %88, %97 : vector<8x32xf32>
    %c0_64 = arith.constant 0 : index
    %c0_65 = arith.constant 0 : index
    %99 = vector.load %arg4[%c0_64, %c0_65] : memref<1x32xf32, #tpu.memory_space<vmem>>, vector<1x32xf32>
    %100 = vector.broadcast %99 : vector<1x32xf32> to vector<8x32xf32>
    %101 = arith.mulf %98, %100 : vector<8x32xf32>
    %c0_66 = arith.constant 0 : index
    %c0_67 = arith.constant 0 : index
    %102 = vector.load %arg5[%c0_66, %c0_67] : memref<1x32xf32, #tpu.memory_space<vmem>>, vector<1x32xf32>
    %103 = vector.broadcast %102 : vector<1x32xf32> to vector<8x32xf32>
    %104 = arith.addf %101, %103 : vector<8x32xf32>
    %c0_68 = arith.constant 0 : index
    %c0_69 = arith.constant 0 : index
    %c0_70 = arith.constant 0 : index
    %105 = vector.load %arg6[%c0_68, %c0_69, %c0_70] : memref<1x8x32xf32, #tpu.memory_space<vmem>>, vector<1x8x32xf32>
    %106 = vector.shape_cast %105 : vector<1x8x32xf32> to vector<8x32xf32>
    %107 = vector.shape_cast %104 : vector<8x32xf32> to vector<1x8x32xf32>
    tpu.vector_store %arg6[%c0_68, %c0_69, %c0_70], %107 {strides = array<i32>} : memref<1x8x32xf32, #tpu.memory_space<vmem>>, vector<1x8x32xf32>,
    return
  }
  func.func @transform_1(%arg0: i32, %arg1: memref<2x8xi32, #tpu.memory_space<smem>>) -> (i32, i32) {
    %c0_i32 = arith.constant 0 : i32
    %c0_i32_0 = arith.constant 0 : i32
    %c0_i32_1 = arith.constant 0 : i32
    return %c0_i32, %c0_i32_0 : i32, i32
  }
  func.func @transform_2(%arg0: i32, %arg1: memref<2x8xi32, #tpu.memory_space<smem>>) -> (i32, i32) {
    %c0_i32 = arith.constant 0 : i32
    %c0_i32_0 = arith.constant 0 : i32
    %c0_i32_1 = arith.constant 0 : i32
    return %c0_i32, %c0_i32_0 : i32, i32
  }
  func.func @transform_3(%arg0: i32, %arg1: memref<2x8xi32, #tpu.memory_space<smem>>) -> (i32, i32) {
    %c0_i32 = arith.constant 0 : i32
    %c0_i32_0 = arith.constant 0 : i32
    %c0_i32_1 = arith.constant 0 : i32
    return %c0_i32, %c0_i32_0 : i32, i32
  }
  func.func @transform_4(%arg0: i32, %arg1: memref<2x8xi32, #tpu.memory_space<smem>>) -> (i32, i32, i32) {
    %c0_i32 = arith.constant 0 : i32
    %c0_i32_0 = arith.constant 0 : i32
    %c0_i32_1 = arith.constant 0 : i32
    return %arg0, %c0_i32, %c0_i32_0 : i32, i32, i32
  }
}

</mosaic_0001>

<bundles_post_ra>
// kernel: tpu_custom_call.1
= control target key start
LH: loop header
LB: loop body
LE: loop exit
PB: predicated region body
PF: predicated region fallthrough
CT: control target
= control target key end

     0   :  { %s836_s21 = smov [#allocation5]   ;;  %s1008_s0 = inlined_call_operand.vmem [shape: s32[2,8], index: 0, kind: input, shape index: {}]   ;;  %s1009_s1 = inlined_call_operand.vmem [shape: f32[128,32], index: 1, kind: input, shape index: {}]   ;;  %s1010_s2 = inlined_call_operand.vmem [shape: f32[8,32], index: 2, kind: input, shape index: {}]   ;;  %s1011_s3 = inlined_call_operand.vmem [shape: f32[1,32], index: 3, kind: input, shape index: {}]   ;;  %s1012_s4 = inlined_call_operand.vmem [shape: f32[1,32], index: 4, kind: input, shape index: {}]   ;;  %s1013_s5 = inlined_call_operand.hbm [shape: f32[2,8,32], index: 5, kind: output, shape index: {}]  }
   0x1   :  { %s11_s20 = sshll.u32 %s1008_s0, 4  ;;  %s12_s20 = int_to_ptr.vmem [resolvable:$true] %s11_s20 }
   0x2   :  { %14 = dma.vmem_to_smem %s12_s20, 32, %s836_s21, [#allocation4] }
   0x3   :  { %798 = dma.done.wait [#allocation4], 32 }
   0x4   :  { %799 = vsyncadd [#allocation4], 4294967264 }
   0x5   :  { %17 = sfence }
   0x6   :  { %18 = vsyncpa [#allocation7], 0 }
   0x7   :  { %20 = vsyncpa [#allocation7 + $0x1], 0  ;;  %s870_s22 = smov 0   ;;  %s872_s23 = smov 0  }
   0x8   :  { %s874_s24 = smov 0   ;;  %s876_s25 = smov 0  }
   0x9 LB: > { %s891_s0 = sadd.s32 4294967295, %s834_s25   ;;  %s681_s26 = sadd.s32 4294967294, %s834_s25   ;;  %s834_s25 = sphi %s876_s25, %s1019_s25   ;;  %s830_s24 = sphi %s874_s24, %s1018_s24   ;;  %s826_s23 = sphi %s872_s23, %s1017_s23   ;;  %s822_s22 = sphi %s870_s22, %s1016_s22  }
   0xa   : > { %s895_s27 = sadd.s32 1, %s834_s25   ;;  %s96_s28 = sadd.s32 1, %s830_s24 }
   0xb   : > { %s93_s29 = ssub.s32 %s834_s25, %s895_s27  ;;  %p106_p0 = scmp.ne.s32.totalorder %s830_s24, %s826_s23 }
   0xc   : > { %p94_p1 = scmp.eq.s32.totalorder %s93_s29, 0  ;;  %p107_p2 = scmp.eq.s32.totalorder %s891_s0, 1 }
   0xd   : > { %p112_p3 = scmp.ne.s32.totalorder %s826_s23, %s822_s22  ;;  %p113_p4 = scmp.eq.s32.totalorder %s681_s26, 1 }
   0xe   : > { %s906_s30 = scalar_select %p94_p1, %s830_s24, %s96_s28  }
   0xf   : > { %p908_p5 = por %p107_p2, %p106_p0  ;;  %p912_p6 = por %p113_p4, %p112_p3 }
  0x10   : > { %p683_p7 = scmp.ge.s32.totalorder %s834_s25, 1  ;;  %p140_p8 = scmp.lt.s32.totalorder %s834_s25, 3 }
  0x12   : > { %p141_p9 = pnand %p683_p7, %p140_p8 }
  0x13   : > { %s156_s8 = sand.u32 (!%p141_p9), 1, %s826_s23   ;;  %s920_s9 = sshll.u32 (!%p141_p9), %s891_s0, 7 }
  0x14   : > { %144 = sbr.rel (%p141_p9) target bundleno = 391 (0x187), region = 32  ;;  %s924_s10 = sshll.u32 (!%p141_p9), %s156_s8, 3 }
  0x15   : > { %s160_s11 = sld [smem:[#allocation5 + %s920_s9]] (!%p141_p9)  ;;  %s158_s15 = scalar_lea.vmem (!%p141_p9), [#allocation6], %s924_s10 }
  0x1b   : > { %s161_s14 = scalar_lea.vmem %s1009_s1, %s160_s11 }
  0x1c   : > { %v176_v0 = vld [vmem:[%s161_s14] sm:$0x1] }
  0x1d   : > { %177 = vst [vmem:[#allocation2] sm:$0x1] %v176_v0 }
  0x1e   : > { %195 = vsyncadd [#allocation3], 16  ;;  %s196_s16 = sadd.s32 1, %s920_s9 }
  0x1f   : > { %s197_s17 = sld [smem:[#allocation5 + %s196_s16]] }
  0x25   : > { %s198_s20 = scalar_lea.vmem %s1009_s1, %s197_s17 }
  0x26   : > { %v215_v1 = vld [vmem:[%s198_s20] sm:$0x1] }
  0x27   : > { %216 = vst [vmem:[#allocation2 + $0x1] sm:$0x1] %v215_v1 }
  0x28   : > { %234 = vsyncadd [#allocation3 + $0x1], 16  ;;  %s235_s21 = sadd.s32 2, %s920_s9 }
  0x29   : > { %s236_s26 = sld [smem:[#allocation5 + %s235_s21]] }
  0x2f   : > { %s237_s11 = scalar_lea.vmem %s1009_s1, %s236_s26 }
  0x30   : > { %v254_v2 = vld [vmem:[%s237_s11] sm:$0x1] }
  0x31   : > { %255 = vst [vmem:[#allocation2 + $0x2] sm:$0x1] %v254_v2 }
  0x32   : > { %273 = vsyncadd [#allocation3 + $0x2], 16  ;;  %s274_s12 = sadd.s32 3, %s920_s9 }
  0x33   : > { %s275_s13 = sld [smem:[#allocation5 + %s274_s12]] }
  0x39   : > { %s276_s17 = scalar_lea.vmem %s1009_s1, %s275_s13 }
  0x3a   : > { %v293_v3 = vld [vmem:[%s276_s17] sm:$0x1] }
  0x3b   : > { %294 = vst [vmem:[#allocation2 + $0x3] sm:$0x1] %v293_v3 }
  0x3c   : > { %312 = vsyncadd [#allocation3 + $0x3], 16  ;;  %s313_s18 = sadd.s32 4, %s920_s9 }
  0x3d   : > { %s314_s19 = sld [smem:[#allocation5 + %s313_s18]] }
  0x43   : > { %s315_s26 = scalar_lea.vmem %s1009_s1, %s314_s19 }
  0x44   : > { %v332_v4 = vld [vmem:[%s315_s26] sm:$0x1] }
  0x45   : > { %333 = vst [vmem:[#allocation2 + $0x4] sm:$0x1] %v332_v4 }
  0x46   : > { %351 = vsyncadd [#allocation3 + $0x4], 16  ;;  %s352_s28 = sadd.s32 5, %s920_s9 }
  0x47   : > { %s353_s29 = sld [smem:[#allocation5 + %s352_s28]] }
  0x4d   : > { %s354_s13 = scalar_lea.vmem %s1009_s1, %s353_s29 }
  0x4e   : > { %v371_v5 = vld [vmem:[%s354_s13] sm:$0x1] }
  0x4f   : > { %372 = vst [vmem:[#allocation2 + $0x5] sm:$0x1] %v371_v5 }
  0x50   : > { %390 = vsyncadd [#allocation3 + $0x5], 16  ;;  %s391_s14 = sadd.s32 6, %s920_s9 }
  0x51   : > { %s392_s16 = sld [smem:[#allocation5 + %s391_s14]] }
  0x57   : > { %s393_s19 = scalar_lea.vmem %s1009_s1, %s392_s16 }
  0x58   : > { %v410_v6 = vld [vmem:[%s393_s19] sm:$0x1] }
  0x59   : > { %411 = vst [vmem:[#allocation2 + $0x6] sm:$0x1] %v410_v6 }
  0x5a   : > { %429 = vsyncadd [#allocation3 + $0x6], 16  ;;  %s430_s20 = sadd.s32 7, %s920_s9 }
  0x5b   : > { %s431_s21 = sld [smem:[#allocation5 + %s430_s20]] }
  0x61   : > { %s432_s29 = scalar_lea.vmem %s1009_s1, %s431_s21 }
  0x62   : > { %v449_v7 = vld [vmem:[%s432_s29] sm:$0x1] }
  0x63   : > { %450 = vst [vmem:[#allocation2 + $0x7] sm:$0x1] %v449_v7 }
  0x64   : > { %468 = vsyncadd [#allocation3 + $0x7], 16 }
  0x65   : > { %800 = dma.done.wait [#allocation3], 16 }
  0x66   : > { %801 = vsyncadd [#allocation3], 4294967280 }
  0x67   : > { %802 = dma.done.wait [#allocation3 + $0x1], 16 }
  0x68   : > { %803 = vsyncadd [#allocation3 + $0x1], 4294967280 }
  0x69   : > { %804 = dma.done.wait [#allocation3 + $0x2], 16 }
  0x6a   : > { %805 = vsyncadd [#allocation3 + $0x2], 4294967280 }
  0x6b   : > { %806 = dma.done.wait [#allocation3 + $0x3], 16 }
  0x6c   : > { %807 = vsyncadd [#allocation3 + $0x3], 4294967280 }
  0x6d   : > { %808 = dma.done.wait [#allocation3 + $0x4], 16 }
  0x6e   : > { %809 = vsyncadd [#allocation3 + $0x4], 4294967280 }
  0x6f   : > { %810 = dma.done.wait [#allocation3 + $0x5], 16 }
  0x70   : > { %811 = vsyncadd [#allocation3 + $0x5], 4294967280 }
  0x71   : > { %812 = dma.done.wait [#allocation3 + $0x6], 16 }
  0x72   : > { %813 = vsyncadd [#allocation3 + $0x6], 4294967280 }
  0x73   : > { %814 = dma.done.wait [#allocation3 + $0x7], 16 }
  0x74   : > { %815 = vsyncadd [#allocation3 + $0x7], 4294967280  ;;  %v486_v8 = vld [vmem:[#allocation2] sm:$0xff]  ;;  %vm489_vm0 = vcmask 261120   ;;  %s687_s12 = sshll.u32 %s891_s0, 3  ;;  %s536_s0 = sshll.u32 %s158_s15, 4  ;;  %s537_s0 = int_to_ptr.vmem [resolvable:$true] %s536_s0 }
  0x75   : > { %v487_v9 = vld [vmem:[%s1010_s2] sm:$0xff]  ;;  %s534_s18 = scalar_lea.hbm %s1013_s5, %s687_s12  ;;  %s524_s26 = scalar_lea.sflag [#allocation7], %s156_s8 }
  0x76   : > { %v488_v10 = vadd.f32 %v487_v9, %v486_v8  ;;  %v738_v26 = vld [vmem:[%s1011_s3] ss:$0 sm:$0xff]  ;;  %s538_s21 = sshll.u32 %s534_s18, 4  ;;  %s774_s12 = scalar_lea.hbm %s1013_s5, 16  ;;  %s539_s21 = int_to_ptr.hbm [resolvable:$true] %s538_s21 }
  0x77   : > { %v739_v29 = vld [vmem:[%s1012_s4] ss:$0 sm:$0xff]  ;;  %s768_s28 = sshra.s32 %s539_s21, 4  ;;  %s769_s28 = int_to_ptr.hbm [resolvable:$true] %s768_s28 }
  0x78   : > { %v490_v11 = vsel %vm489_vm0, %v488_v10, 0.0  ;;  %s770_s29 = scalar_lea.hbm %s769_s28, 8  ;;  %p775_p13 = scmp.lt.s32.totalorder %s769_s28, %s1013_s5 }
  0x79   : > { %491 = vadd.xlane.f32.xlu0 %v490_v11  ;;  %p771_p10 = scmp.ne.s32.totalorder %s769_s28, %s770_s29  ;;  %p776_p0 = scmp.lt.s32.totalorder %s774_s12, %s770_s29 }
  0x7b   : > { %p772_p11 = pnand %p771_p10, %p908_p5  ;;  %p777_p1 = por %p776_p0, %p775_p13 }
  0x7d   : > { %p773_p12 = pneg %p772_p11 }
  0x7f   : > { %p778_p2 = pnand %p777_p1, %p773_p12 }
  0xec   : > { %v492_v12 = vpop.xlane.xlu0 %491 }
  0xed   : > { %v493_v13 = vmul.f32 0.03125, %v492_v12 }
  0xef   : > { %v494_v14 = vsub.f32 %v488_v10, %v493_v13 }
  0xf1   : > { %v495_v15 = vmul.f32 %v494_v14, %v494_v14 }
  0xf3   : > { %v496_v16 = vsel %vm489_vm0, %v495_v15, 0.0 }
  0xf4   : > { %497 = vadd.xlane.f32.xlu0 %v496_v16 }
 0x167   : > { %v498_v17 = vpop.xlane.xlu0 %497 }
 0x168   : > { %v499_v18 = vmul.f32 0.03125, %v498_v17 }
 0x16a   : > { %v500_v19 = vadd.f32 1e-12, %v499_v18 }
 0x16c   : > { %740 = vrsqrt.f32 %v500_v19  ;;  %vm507_vm2 = vweird.f32 %v500_v19 }
 0x172   : > { %v741_v20 = vpop.eup %740 }
 0x173   : > { %v502_v21 = vmul.f32 %v741_v20, %v500_v19  ;;  %vm508_vm1 = vweird.f32 %v741_v20 }
 0x174   : > { %vm509_vm3 = vmor %vm507_vm2, %vm508_vm1 }
 0x175   : > { %v503_v22 = vmul.f32 %v741_v20, %v502_v21 }
 0x177   : > { %v504_v23 = vmul.f32 0.5, %v503_v22 }
 0x179   : > { %v505_v24 = vsub.f32 1.5, %v504_v23 }
 0x17b   : > { %v506_v25 = vmul.f32 %v741_v20, %v505_v24 }
 0x17d   : > { %v510_v27 = vsel %vm509_vm3, %v741_v20, %v506_v25 }
 0x17e   : > { %v511_v28 = vmul.f32 %v510_v27, %v494_v14 }
 0x180   : > { %v516_v30 = vmul.f32 %v738_v26, %v511_v28 }
 0x182   : > { %v521_v31 = vadd.f32 %v739_v29, %v516_v30 }
 0x184   : > { %522 = vst.msk [vmem:[%s158_s15] sm:$0xff] %vm489_vm0, %v521_v31 }
 0x185   : > { %781 = shalt.err (!%p778_p2)
}
 0x186   : > { %698 = dma.vmem_to_hbm [thread:$0]  (%p908_p5), %s537_s0, 128, %s539_s21, %s524_s26  }
 0x187 PF: > { %p704_p3 = scmp.ge.s32.totalorder %s834_s25, 2  ;;  %s550_s8 = sand.u32 1, %s822_s22  }
 0x188   : > { %s551_s10 = scalar_lea.sflag [#allocation7], %s550_s8 }
 0x189   : > { %p701_p4 = pnand %p704_p3, %p912_p6 }
 0x18b   : > { %p702_p7 = pneg %p701_p4 }
 0x18d   : > { %817 = dma.done.wait (%p702_p7), %s551_s10, 128  }
 0x18e   : > { %819 = vsyncadd (%p702_p7), %s551_s10, 4294967168  ;;  %p23_p8 = scmp.ge.s32.totalorder %s895_s27, 4   ;;  %s1016_s22 = smov %s826_s23 }
 0x18f   : > { %s1017_s23 = smov %s830_s24  ;;  %s1018_s24 = smov %s906_s30 }
 0x190   : > { %s1019_s25 = smov %s895_s27  ;;  %25 = sbr.rel (!%p23_p8) target bundleno = 9 (0x9), region = 365 }
 0x195   :  { %557 = vsyncpa [#allocation7], 1 }
 0x196   :  { %559 = vsyncpa [#allocation7 + $0x1], 1 }
 0x197   :  { %560 = vsyncmov [#allocation3] }
 0x19a   :  { %s561_s25 = vpop.sfrf %560 }
 0x19b   :  { %p690_p5 = scmp.ne.s32.totalorder %s561_s25, 0 }
 0x19d   :  { %565 = shalt.err (%p690_p5)  }
 0x19e   :  { %567 = vsyncmov [#allocation3 + $0x1] }
 0x1a1   :  { %s568_s6 = vpop.sfrf %567 }
 0x1a2   :  { %p691_p6 = scmp.ne.s32.totalorder %s568_s6, 0 }
 0x1a4   :  { %572 = shalt.err (%p691_p6)  }
 0x1a5   :  { %574 = vsyncmov [#allocation3 + $0x2] }
 0x1a8   :  { %s575_s7 = vpop.sfrf %574 }
 0x1a9   :  { %p692_p9 = scmp.ne.s32.totalorder %s575_s7, 0 }
 0x1ab   :  { %579 = shalt.err (%p692_p9)  }
 0x1ac   :  { %581 = vsyncmov [#allocation3 + $0x3] }
 0x1af   :  { %s582_s15 = vpop.sfrf %581 }
 0x1b0   :  { %p693_p10 = scmp.ne.s32.totalorder %s582_s15, 0 }
 0x1b2   :  { %586 = shalt.err (%p693_p10)  }
 0x1b3   :  { %588 = vsyncmov [#allocation3 + $0x4] }
 0x1b6   :  { %s589_s27 = vpop.sfrf %588 }
 0x1b7   :  { %p694_p11 = scmp.ne.s32.totalorder %s589_s27, 0 }
 0x1b9   :  { %593 = shalt.err (%p694_p11)  }
 0x1ba   :  { %595 = vsyncmov [#allocation3 + $0x5] }
 0x1bd   :  { %s596_s1 = vpop.sfrf %595 }
 0x1be   :  { %p695_p12 = scmp.ne.s32.totalorder %s596_s1, 0 }
 0x1c0   :  { %600 = shalt.err (%p695_p12)  }
 0x1c1   :  { %602 = vsyncmov [#allocation3 + $0x6] }
 0x1c4   :  { %s603_s2 = vpop.sfrf %602 }
 0x1c5   :  { %p696_p13 = scmp.ne.s32.totalorder %s603_s2, 0 }
 0x1c7   :  { %607 = shalt.err (%p696_p13)  }
 0x1c8   :  { %609 = vsyncmov [#allocation3 + $0x7] }
 0x1cb   :  { %s610_s3 = vpop.sfrf %609 }
 0x1cc   :  { %p697_p0 = scmp.ne.s32.totalorder %s610_s3, 0 }
 0x1ce   :  { %614 = shalt.err (%p697_p0)  }

</bundles_post_ra>
